<compile_context>
chip_gen: v7x
topology: tpu7x:2x2x1
jax: 0.10.0
libtpu: 0.0.40
codegen_flags: <defaults>
</compile_context>

<pallas_src>
import functools

import numpy as np
import jax
import jax.numpy as jnp
from jax import lax
from jax.experimental import pallas as pl
from jax.experimental.pallas import tpu as pltpu


def _round_up(x, m):
    return ((x + m - 1) // m) * m


# ----------------------------------------------------------------------------
# Kernel 1: fused projections + attention + softmax-over-time, Bblk batches/step
# ----------------------------------------------------------------------------
def _attn_kernel(x_ref, w_ref, b_ref, out_ref, *, T, Np1, BU, Cpad):
    bblk, _, IU = x_ref.shape
    W = w_ref.shape[1]
    # One fused projection matmul for [query | key | mem_attn | mem_entry].
    x2 = x_ref[...].reshape(bblk * T, IU)
    proj = jnp.dot(x2, w_ref[...], preferred_element_type=jnp.float32) + b_ref[...]
    proj = proj.reshape(bblk, T, W)
    q = proj[:, :, 0:Np1]                      # 1/sqrt(N+1) already folded into wq/bq
    k = proj[:, :, Np1:2 * Np1]
    a = proj[:, :, 2 * Np1:3 * Np1]
    e = jnp.maximum(proj[:, :, 3 * Np1:3 * Np1 + BU], 0.0)   # mem_entry ReLU
    # attn = (q k^T) a, batched over the Bblk batches in this block.
    s = jnp.einsum('btd,bsd->bts', q, k, preferred_element_type=jnp.float32)
    attn = jnp.einsum('bts,bsn->btn', s, a, preferred_element_type=jnp.float32)
    # nn.Softmax(1) on a (B, T, N+1) tensor == softmax over the time axis.
    m = jnp.max(attn, axis=1, keepdims=True)
    ex = jnp.exp(attn - m)
    denom = jnp.sum(ex, axis=1, keepdims=True)
    sm = ex * pl.reciprocal(denom, approx=True)
    # Single lane-dense store: [softmax | relu(entry) | zero pad] -> Cpad lanes.
    pieces = [sm, e]
    pad_w = Cpad - (Np1 + BU)
    if pad_w:
        pieces.append(jnp.zeros((bblk, T, pad_w), jnp.float32))
    out_ref[...] = jnp.concatenate(pieces, axis=-1)


def _choose_bblk(B, T, IU, Cpad):
    target = max(1, 256 // max(T, 1))              # aim ~256 rows per projection matmul
    per_b = 4 * T * (IU + 3 * Cpad + 2 * T)        # rough in-flight bytes per batch
    cap = max(1, (8 << 20) // max(per_b, 1))       # stay well inside scoped VMEM (v7x: 64 MiB)
    bblk = max(1, min(B, target, cap))
    if B >= 2:
        bblk = min(bblk, (B + 1) // 2)             # keep >=2 grid steps for v7x megacore
    return bblk


def amu_attention(x, wq, bq, wk, bk, wa, ba, we, be):
    """Returns softmax_weights (B, T, N+1) and ReLU(mem_entry) (B, T, BU)."""
    B, T, IU = x.shape
    Np1 = wq.shape[1]
    BU = we.shape[1]
    scale = float(1.0 / np.power(Np1, 0.5))
    # Fold the 1/sqrt(N+1) scale into the query projection; fuse all four
    # projection weights into a single MXU pass.
    w_fused = jnp.concatenate([wq * scale, wk, wa, we], axis=1)       # (IU, 3*Np1+BU)
    b_fused = jnp.concatenate([bq * scale, bk, ba, be], axis=1)       # (1, 3*Np1+BU)
    Wtot = 3 * Np1 + BU
    Cpad = _round_up(Np1 + BU, 128)

    bblk = _choose_bblk(B, T, IU, Cpad)
    Bpad = _round_up(B, bblk)
    if Bpad != B:
        x = jnp.concatenate([x, jnp.zeros((Bpad - B, T, IU), x.dtype)], axis=0)
    nb = Bpad // bblk

    kernel = functools.partial(_attn_kernel, T=T, Np1=Np1, BU=BU, Cpad=Cpad)
    full = lambda i: (0, 0)
    out = pl.pallas_call(
        kernel,
        out_shape=jax.ShapeDtypeStruct((Bpad, T, Cpad), jnp.float32),
        grid_spec=pltpu.PrefetchScalarGridSpec(
            num_scalar_prefetch=0,
            grid=(nb,),
            in_specs=[
                pl.BlockSpec((bblk, T, IU), lambda i: (i, 0, 0)),
                pl.BlockSpec((IU, Wtot), full),
                pl.BlockSpec((1, Wtot), full),
            ],
            out_specs=pl.BlockSpec((bblk, T, Cpad), lambda i: (i, 0, 0))),
        compiler_params=pltpu.CompilerParams(
            dimension_semantics=("parallel",),
            vmem_limit_bytes=32 * 1024 * 1024),
    )(x.astype(jnp.float32), w_fused, b_fused)
    sm = out[:B, :, :Np1]
    entry = out[:B, :, Np1:Np1 + BU]
    return sm, entry


# ----------------------------------------------------------------------------
# Kernel 2: final Linear on flattened rows, lane-dense padded output
# ----------------------------------------------------------------------------
def _linear_kernel(x_ref, w_ref, b_ref, o_ref):
    o_ref[...] = (jnp.dot(x_ref[...], w_ref[...], preferred_element_type=jnp.float32)
                  + b_ref[...]).astype(o_ref.dtype)


def amu_linear(x2d, w, b):
    """y = x2d @ w + b on flattened (rows, features); output lanes padded to 128."""
    R, F = x2d.shape
    OU = w.shape[1]
    OUpad = _round_up(OU, 128)
    if OUpad != OU:
        w = jnp.concatenate([w, jnp.zeros((F, OUpad - OU), w.dtype)], axis=1)
        b = jnp.concatenate([b, jnp.zeros((1, OUpad - OU), b.dtype)], axis=1)

    # Row tile: multiple of 8, keep >=2 grid steps when possible (v7x megacore).
    if R >= 512:
        rt = 256
    elif R >= 16:
        rt = max(8, ((R // 2) // 8) * 8)
    else:
        rt = 8
    Rpad = _round_up(R, rt)
    if Rpad != R:
        x2d = jnp.concatenate([x2d, jnp.zeros((Rpad - R, F), x2d.dtype)], axis=0)

    full = lambda i: (0, 0)
    out = pl.pallas_call(
        _linear_kernel,
        out_shape=jax.ShapeDtypeStruct((Rpad, OUpad), jnp.float32),
        grid_spec=pltpu.PrefetchScalarGridSpec(
            num_scalar_prefetch=0,
            grid=(Rpad // rt,),
            in_specs=[pl.BlockSpec((rt, F), lambda i: (i, 0)),
                      pl.BlockSpec((F, OUpad), full),
                      pl.BlockSpec((1, OUpad), full)],
            out_specs=pl.BlockSpec((rt, OUpad), lambda i: (i, 0))),
        compiler_params=pltpu.CompilerParams(
            dimension_semantics=("parallel",),
            vmem_limit_bytes=32 * 1024 * 1024),
    )(x2d.astype(jnp.float32), w, b)
    return out[:R, :OU]


# ----------------------------------------------------------------------------
# Full AMU forward (memory loop in plain JAX, matmuls/softmax in Pallas)
# ----------------------------------------------------------------------------
def amu_forward(params, inp, memory=None):
    B, T, _ = inp.shape
    Np1 = params["wq"].shape[1]
    N = Np1 - 1
    BU = params["we"].shape[1]
    OU = params["wl"].shape[1]

    sm, entry = amu_attention(inp, params["wq"], params["bq"], params["wk"],
                              params["bk"], params["wa"], params["ba"],
                              params["we"], params["be"])
    # TODO(synk): attn_dropout is an identity here (eval-mode semantics).
    attn_last = sm[:, -1, :][:, :, None]                         # (B, N+1, 1)

    if memory is None:
        memory = jnp.zeros((B, N, BU), jnp.float32)              # zeros memory, batch-repeated

    # TODO(synk): this sequential data-dependent memory update (argmin +
    # cross-batch scatter with torch advanced-indexing semantics) stays in JAX.
    def step(mem, i):
        entry_i = entry[:, i, :]                                          # (B, BU)
        mem_cat = jnp.concatenate([mem, entry_i[:, None, :]], axis=1)     # (B, N+1, BU)
        idx = jnp.argmin(sm[:, i, :], axis=-1)                            # (B,)
        last = mem_cat[:, -1, :]                                          # (B, BU)
        # Reproduce torch `memory[:, idx, :] = memory[:, -1, :]`:
        # row idx[j] of EVERY batch gets last[j]; on collisions largest j wins.
        n_range = jnp.arange(Np1)
        match = idx[None, :] == n_range[:, None]                          # (N+1, B)
        any_match = jnp.any(match, axis=1)                                # (N+1,)
        j_star = jnp.max(jnp.where(match, jnp.arange(B)[None, :], -1), axis=1)
        repl = last[jnp.maximum(j_star, 0)]                               # (N+1, BU)
        in_mem = jnp.where(any_match[None, :, None], repl[None, :, :], mem_cat)
        new_mem = in_mem[:, :N, :]
        return new_mem, (in_mem, new_mem)

    _, (in_mems, out_mems) = jax.lax.scan(step, memory, jnp.arange(T))
    out_mem = out_mems[-1]                                        # (B, N, BU)

    out4 = attn_last[None, :, :, :] * in_mems                     # (T, B, N+1, BU)
    # Matches torch `.view(B, -1, (N+1)*BU)` on the contiguous (T,B,N+1,BU)
    # buffer exactly: row-major reinterpretation mixing T and B, preserved here
    # by flattening to (T*B, (N+1)*BU) rows and re-viewing the result as (B,T,OU).
    out_flat = out4.reshape(T * B, Np1 * BU)
    out2d = amu_linear(out_flat, params["wl"], params["bl"])      # (T*B, OU)
    output = out2d.reshape(B, T, OU)
    # NOTE: torch also stores out_mem[0] back into self.memory (stateful); the
    # functional equivalent is returning out_mem.
    return output, out_mem


def init_params(key, input_units, block_units, num_blocks, output_units):
    Np1 = num_blocks + 1
    ks = jax.random.split(key, 10)

    def lin(kw, kb, fan_in, fan_out):
        bound = 1.0 / np.sqrt(fan_in)
        w = jax.random.uniform(kw, (fan_in, fan_out), jnp.float32, -bound, bound)
        b = jax.random.uniform(kb, (1, fan_out), jnp.float32, -bound, bound)
        return w, b

    wq, bq = lin(ks[0], ks[1], input_units, Np1)
    wk, bk = lin(ks[2], ks[3], input_units, Np1)
    wa, ba = lin(ks[4], ks[5], input_units, Np1)
    we, be = lin(ks[6], ks[7], input_units, block_units)
    wl, bl = lin(ks[8], ks[9], block_units * Np1, output_units)
    return dict(wq=wq, bq=bq, wk=wk, bk=bk, wa=wa, ba=ba,
                we=we, be=be, wl=wl, bl=bl)


if __name__ == "__main__":
    B, T = 2, 8
    input_units, block_units, num_blocks, output_units = 16, 8, 4, 4

    key = jax.random.PRNGKey(0)
    kx, kp = jax.random.split(key)
    x = jax.random.normal(kx, (B, T, input_units), dtype=jnp.float32)
    params = init_params(kp, input_units, block_units, num_blocks, output_units)

    output, out_mem = amu_forward(params, x)
    jax.block_until_ready((output, out_mem))

    assert output.shape == (B, T, output_units), output.shape
    assert out_mem.shape == (B, num_blocks, block_units), out_mem.shape
    assert bool(jnp.all(jnp.isfinite(output))), "non-finite output"
    print("KERNEL_OK")
</pallas_src>

<mosaic_0001>
module attributes {stable_mosaic.version = 11 : i64} {
  func.func @_attn_kernel(%arg0: i32, %arg1: memref<1x8x16xf32, #tpu.memory_space<vmem>>, %arg2: memref<16x23xf32, #tpu.memory_space<vmem>>, %arg3: memref<1x23xf32, #tpu.memory_space<vmem>>, %arg4: memref<1x8x128xf32, #tpu.memory_space<vmem>>) attributes {dimension_semantics = [#tpu.dimension_semantics<parallel>], iteration_bounds = array<i64: 2>, scalar_prefetch = 0 : i64, scratch_operands = 0 : i64, tpu.core_type = #tpu.core_type<tc>, window_params = [{transform_indices = @transform_0, window_bounds = array<i64: 1, 8, 16>}, {pipeline_mode = #tpu.pipeline_mode<synchronous>, transform_indices = @transform_1, window_bounds = array<i64: 16, 23>}, {pipeline_mode = #tpu.pipeline_mode<synchronous>, transform_indices = @transform_2, window_bounds = array<i64: 1, 23>}, {transform_indices = @transform_3, window_bounds = array<i64: 1, 8, 128>}]} {
    %c0 = arith.constant 0 : index
    %c0_0 = arith.constant 0 : index
    %c0_1 = arith.constant 0 : index
    %0 = vector.load %arg1[%c0, %c0_0, %c0_1] : memref<1x8x16xf32, #tpu.memory_space<vmem>>, vector<1x8x16xf32>
    %1 = vector.shape_cast %0 : vector<1x8x16xf32> to vector<8x16xf32>
    %c0_2 = arith.constant 0 : index
    %c0_3 = arith.constant 0 : index
    %2 = vector.load %arg2[%c0_2, %c0_3] : memref<16x23xf32, #tpu.memory_space<vmem>>, vector<16x23xf32>
    %cst = arith.constant dense<0.000000e+00> : vector<8x23xf32>
    %3 = tpu.matmul %1, %2, %cst {dimension_numbers = #tpu.dot_dimension_numbers<[1], [0], [0], [1], [0, 0, 1, 1], [], []>} : vector<8x16xf32>, vector<16x23xf32>, vector<8x23xf32> -> vector<8x23xf32>
    %c0_4 = arith.constant 0 : index
    %c0_5 = arith.constant 0 : index
    %4 = vector.load %arg3[%c0_4, %c0_5] : memref<1x23xf32, #tpu.memory_space<vmem>>, vector<1x23xf32>
    %5 = vector.broadcast %4 : vector<1x23xf32> to vector<8x23xf32>
    %6 = arith.addf %3, %5 : vector<8x23xf32>
    %7 = vector.shape_cast %6 : vector<8x23xf32> to vector<1x8x23xf32>
    %8 = vector.extract_strided_slice %7 {offsets = [0, 0, 0], sizes = [1, 8, 5], strides = [1, 1, 1]} : vector<1x8x23xf32> to vector<1x8x5xf32>
    %9 = vector.extract_strided_slice %7 {offsets = [0, 0, 5], sizes = [1, 8, 5], strides = [1, 1, 1]} : vector<1x8x23xf32> to vector<1x8x5xf32>
    %10 = vector.extract_strided_slice %7 {offsets = [0, 0, 10], sizes = [1, 8, 5], strides = [1, 1, 1]} : vector<1x8x23xf32> to vector<1x8x5xf32>
    %11 = vector.extract_strided_slice %7 {offsets = [0, 0, 15], sizes = [1, 8, 8], strides = [1, 1, 1]} : vector<1x8x23xf32> to vector<1x8x8xf32>
    %cst_6 = arith.constant 0.000000e+00 : f32
    %12 = vector.broadcast %cst_6 : f32 to vector<1x8x8xf32>
    %13 = arith.maximumf %11, %12 : vector<1x8x8xf32>
    "tpu.trace_start"() <{level = 10 : i32, message = "btd,bsd->bts"}> : () -> ()
    %cst_7 = arith.constant dense<0.000000e+00> : vector<1x8x8xf32>
    %14 = tpu.matmul %8, %9, %cst_7 {dimension_numbers = #tpu.dot_dimension_numbers<[2], [2], [1], [1], [0, 0, 0, 1, 1, 1], [0], [0]>} : vector<1x8x5xf32>, vector<1x8x5xf32>, vector<1x8x8xf32> -> vector<1x8x8xf32>
    "tpu.trace_stop"() : () -> ()
    "tpu.trace_start"() <{level = 10 : i32, message = "bts,bsn->btn"}> : () -> ()
    %cst_8 = arith.constant dense<0.000000e+00> : vector<1x8x5xf32>
    %15 = tpu.matmul %14, %10, %cst_8 {dimension_numbers = #tpu.dot_dimension_numbers<[2], [1], [1], [2], [0, 0, 0, 1, 1, 2], [0], [0]>} : vector<1x8x8xf32>, vector<1x8x5xf32>, vector<1x8x5xf32> -> vector<1x8x5xf32>
    "tpu.trace_stop"() : () -> ()
    %cst_9 = arith.constant dense<0xFF800000> : vector<1x5xf32>
    %16 = vector.multi_reduction <maximumf>, %15, %cst_9 [1] : vector<1x8x5xf32> to vector<1x5xf32>
    %17 = vector.shape_cast %16 : vector<1x5xf32> to vector<1x1x5xf32>
    %18 = vector.broadcast %17 : vector<1x1x5xf32> to vector<1x8x5xf32>
    %19 = arith.subf %15, %18 : vector<1x8x5xf32>
    %20 = math.exp %19 : vector<1x8x5xf32>
    %cst_10 = arith.constant dense<0.000000e+00> : vector<1x5xf32>
    %21 = vector.multi_reduction <add>, %20, %cst_10 [1] : vector<1x8x5xf32> to vector<1x5xf32>
    %22 = vector.shape_cast %21 : vector<1x5xf32> to vector<1x1x5xf32>
    %23 = tpu.reciprocal %22 {approx = true} : vector<1x1x5xf32> -> vector<1x1x5xf32>
    %24 = vector.broadcast %23 : vector<1x1x5xf32> to vector<1x8x5xf32>
    %25 = arith.mulf %20, %24 : vector<1x8x5xf32>
    %cst_11 = arith.constant 0.000000e+00 : f32
    %26 = vector.broadcast %cst_11 : f32 to vector<1x8x115xf32>
    %27 = tpu.concatenate %25, %13, %26 in 2 : vector<1x8x5xf32>, vector<1x8x8xf32>, vector<1x8x115xf32> -> vector<1x8x128xf32>
    %c0_12 = arith.constant 0 : index
    %c0_13 = arith.constant 0 : index
    %c0_14 = arith.constant 0 : index
    %28 = vector.load %arg4[%c0_12, %c0_13, %c0_14] : memref<1x8x128xf32, #tpu.memory_space<vmem>>, vector<1x8x128xf32>
    tpu.vector_store %arg4[%c0_12, %c0_13, %c0_14], %27 {strides = array<i32>} : memref<1x8x128xf32, #tpu.memory_space<vmem>>, vector<1x8x128xf32>,
    return
  }
  func.func @transform_0(%arg0: i32) -> (i32, i32, i32) {
    %c0_i32 = arith.constant 0 : i32
    %c0_i32_0 = arith.constant 0 : i32
    %c0_i32_1 = arith.constant 0 : i32
    return %arg0, %c0_i32, %c0_i32_0 : i32, i32, i32
  }
  func.func @transform_1(%arg0: i32) -> (i32, i32) {
    %c0_i32 = arith.constant 0 : i32
    %c0_i32_0 = arith.constant 0 : i32
    %c0_i32_1 = arith.constant 0 : i32
    return %c0_i32, %c0_i32_0 : i32, i32
  }
  func.func @transform_2(%arg0: i32) -> (i32, i32) {
    %c0_i32 = arith.constant 0 : i32
    %c0_i32_0 = arith.constant 0 : i32
    %c0_i32_1 = arith.constant 0 : i32
    return %c0_i32, %c0_i32_0 : i32, i32
  }
  func.func @transform_3(%arg0: i32) -> (i32, i32, i32) {
    %c0_i32 = arith.constant 0 : i32
    %c0_i32_0 = arith.constant 0 : i32
    %c0_i32_1 = arith.constant 0 : i32
    return %arg0, %c0_i32, %c0_i32_0 : i32, i32, i32
  }
}

</mosaic_0001>

<bundles_post_ra>
// kernel: tpu_custom_call.1
= control target key start
LH: loop header
LB: loop body
LE: loop exit
PB: predicated region body
PF: predicated region fallthrough
CT: control target
= control target key end

     0   :  { %8 = vsyncpa [#allocation3], 0  ;;  %s1044_s0 = inlined_call_operand.hbm [shape: f32[2,8,16], index: 0, kind: input, shape index: {}]   ;;  %s1045_s1 = inlined_call_operand.hbm [shape: f32[16,23], index: 1, kind: input, shape index: {}]   ;;  %s1046_s2 = inlined_call_operand.vmem [shape: f32[1,23], index: 2, kind: input, shape index: {}]   ;;  %s1047_s3 = inlined_call_operand.hbm [shape: f32[2,8,128], index: 3, kind: output, shape index: {}]  }
   0x1   :  { %10 = vsyncpa [#allocation3 + $0x1], 0 }
   0x2   :  { %11 = vsyncpa [#allocation6], 0 }
   0x3   :  { %12 = vsyncpa [#allocation4], 0 }
   0x4   :  { %14 = vsyncpa [#allocation4 + $0x1], 0  ;;  %s836_s12 = smov 0   ;;  %s838_s13 = smov 0  }
   0x5   :  { %s840_s14 = smov 0   ;;  %s842_s15 = smov 0  }
   0x6 LB: > { %s857_s16 = sadd.s32 4294967295, %s804_s15   ;;  %s562_s17 = sadd.s32 4294967294, %s804_s15   ;;  %s804_s15 = sphi %s842_s15, %s1067_s15   ;;  %s800_s14 = sphi %s840_s14, %s1066_s14   ;;  %s796_s13 = sphi %s838_s13, %s1065_s13   ;;  %s792_s12 = sphi %s836_s12, %s1064_s12  }
   0x7   : > { %p40_p0 = scmp.ne.s32.totalorder %s796_s13, %s792_s12  ;;  %p1048_p1 = scmp.eq.s32.totalorder %s857_s16, 0 }
   0x8   : > { %p112_p3 = scmp.eq.s32.totalorder %s562_s17, 1  ;;  %p563_p5 = scmp.ge.s32.totalorder %s804_s15, 1 }
   0x9   : > { %p866_p4 = por %p1048_p1, %p40_p0  ;;  %p119_p7 = scmp.lt.s32.totalorder %s804_s15, 3 }
   0xa   : > { %p871_p6 = por %p112_p3, %p40_p0  ;;  %s806_s21 = smov [#allocation5]  }
   0xb   : > { %s1051_s18 = scalar_select %p866_p4, 1, 0 }
   0xc   : > { %s1052_s19 = scalar_select %p871_p6, 1, 0 }
   0xd   : > { %p876_p8 = pnand %p563_p5, %p119_p7  ;;  %s131_s22 = sshll.u32 %s806_s21, 4  ;;  %s880_s22 = int_to_ptr.vmem [resolvable:$true] %s131_s22 }
   0xe   : > { %s892_s24 = sadd.s32 1, %s804_s15   ;;  %s27_s25 = sadd.s32 1, %s800_s14 }
   0xf   : > { %s1053_s20 = scalar_select %p876_p8, 1, 0 }
  0x10   : > { %p616_p9 = pneg %p876_p8  ;;  %s24_s26 = ssub.s32 %s804_s15, %s892_s24 }
  0x11   : > { %s676_s29 = scalar_lea.hbm %s1045_s1, 256 }
  0x12   : > { %p887_p11 = pnand %p616_p9, %p1048_p1  ;;  %p677_p12 = scmp.ne.s32.totalorder %s1045_s1, %s676_s29 }
  0x13   : > { %p683_p5 = scmp.lt.u32.totalorder %s676_s29, %s1045_s1 }
  0x14   : > { %p678_p13 = pneg %p887_p11 }
  0x16   : > { %p679_p0 = pnand %p678_p13, %p677_p12 }
  0x18   : > { %p680_p3 = pneg %p679_p0 }
  0x1a   : > { %p685_p7 = pnand %p683_p5, %p680_p3 }
  0x1c   : > { %688 = shalt.err (!%p685_p7)
}
  0x1d   : > { %s689_s7 = scalar_lea.vmem %s880_s22, 256  ;;  %p697_p2 = scmp.lt.s32.totalorder %s880_s22, %s880_s22 }
  0x1e   : > { %p690_p9 = scmp.ne.s32.totalorder %s880_s22, %s689_s7  ;;  %p698_p6 = scmp.lt.s32.totalorder %s689_s7, %s689_s7 }
  0x20   : > { %p692_p10 = pnand %p690_p9, %p678_p13  ;;  %p699_p4 = por %p698_p6, %p697_p2 }
  0x22   : > { %p693_p1 = pneg %p692_p10 }
  0x24   : > { %p700_p8 = pnand %p699_p4, %p693_p1 }
  0x26   : > { %703 = shalt.err (!%p700_p8)
}
  0x27   : > { %s807_s8 = smov 128   ;;  %s808_s9 = smov 8  }
  0x28   : > { %619 = dma.hbm_to_vmem [thread:$0]  (!%p887_p11), %s1045_s1, 256, %s880_s22, [#allocation6], %s807_s8, %s807_s8, %s808_s9  }
  0x29   : > { %p25_p2 = scmp.eq.s32.totalorder %s24_s26, 0  ;;  %p34_p1 = scmp.ne.s32.totalorder %s800_s14, %s796_s13 }
  0x2a   : > { %p35_p4 = scmp.eq.s32.totalorder %s804_s15, 0  ;;  %p629_p6 = scmp.lt.s32.totalorder %s804_s15, 2 }
  0x2b   : > { %s923_s17 = scalar_select %p25_p2, %s800_s14, %s27_s25  }
  0x2c   : > { %p36_p8 = por %p35_p4, %p34_p1  ;;  %p1055_p10 = scmp.eq.s32.totalorder %s857_s16, 1 }
  0x2d   : > { %s148_s27 = sand.u32 1, %s800_s14   ;;  %s567_s28 = sshll.u32 %s804_s15, 7 }
  0x2e   : > { %p927_p12 = por %p1055_p10, %p34_p1  ;;  %s566_s29 = sshll.u32 %s148_s27, 3 }
  0x2f   : > { %s936_s4 = scalar_lea.hbm %s1044_s0, %s567_s28  ;;  %s152_s22 = scalar_lea.vmem [#allocation2], %s566_s29 }
  0x30   : > { %s159_s25 = sshll.u32 %s152_s22, 4  ;;  %p938_p11 = pnand %p629_p6, %p36_p8  ;;  %s942_s25 = int_to_ptr.vmem [resolvable:$true] %s159_s25 }
  0x31   : > { %s149_s5 = scalar_lea.sflag [#allocation3], %s148_s27  ;;  %s704_s6 = scalar_lea.hbm %s936_s4, 128 }
  0x32   : > { %p705_p13 = scmp.ne.s32.totalorder %s936_s4, %s704_s6  ;;  %p706_p0 = pneg %p938_p11 }
  0x33   : > { %s709_s9 = scalar_lea.hbm %s1044_s0, 256  ;;  %p710_p7 = scmp.lt.u32.totalorder %s936_s4, %s1044_s0 }
  0x34   : > { %p707_p3 = pnand %p706_p0, %p705_p13  ;;  %p711_p9 = scmp.lt.u32.totalorder %s709_s9, %s704_s6 }
  0x35   : > { %p713_p1 = scmp.lt.u32.totalorder %s704_s6, %s936_s4 }
  0x36   : > { %p708_p5 = pneg %p707_p3  ;;  %p712_p2 = por %p711_p9, %p710_p7 }
  0x38   : > { %p714_p4 = por %p713_p1, %p712_p2 }
  0x3a   : > { %p715_p6 = pnand %p714_p4, %p708_p5 }
  0x3c   : > { %718 = shalt.err (!%p715_p6)
}
  0x3d   : > { %s719_s27 = scalar_lea.vmem %s942_s25, 128  ;;  %s809_s28 = smov [#allocation2]  }
  0x3e   : > { %p720_p8 = scmp.ne.s32.totalorder %s942_s25, %s719_s27  ;;  %s724_s29 = sshll.u32 %s809_s28, 4  ;;  %s725_s29 = int_to_ptr.vmem [resolvable:$false] %s724_s29 }
  0x3f   : > { %s726_s23 = scalar_lea.vmem %s725_s29, 256  ;;  %p727_p3 = scmp.lt.s32.totalorder %s942_s25, %s725_s29 }
  0x40   : > { %p722_p10 = pnand %p720_p8, %p706_p0  ;;  %p728_p7 = scmp.lt.s32.totalorder %s726_s23, %s719_s27 }
  0x42   : > { %p723_p13 = pneg %p722_p10  ;;  %p729_p9 = por %p728_p7, %p727_p3 }
  0x44   : > { %p730_p2 = pnand %p729_p9, %p723_p13 }
  0x46   : > { %733 = shalt.err (!%p730_p2)
}
  0x47   : > { %623 = dma.hbm_to_vmem [thread:$0]  (!%p938_p11), %s936_s4, 128, %s942_s25, %s149_s5  }
  0x48   : > { %p1058_p5 = scmp.ne.s32.totalorder %s1053_s20, 0 }
  0x49   : > { %s972_s30 = sand.u32 (!%p1058_p5), 1, %s796_s13   ;;  %p1059_p0 = scmp.ne.s32.totalorder (!%p1058_p5), %s1051_s18, 0 }
  0x4a   : > { %168 = sbr.rel (%p1058_p5) target bundleno = 917 (0x395), region = 32  ;;  %s569_s22 = sshll.u32 (!%p1058_p5), %s972_s30, 3 }
  0x4b   : > { %s171_s6 = scalar_lea.sflag (!%p1058_p5), [#allocation3], %s972_s30  ;;  %s174_s7 = scalar_lea.vmem (!%p1058_p5), [#allocation2], %s569_s22 }
  0x51   : > { %779 = dma.done.wait (%p1059_p0), %s171_s6, 128  }
  0x52   : > { %781 = vsyncadd (%p1059_p0), %s171_s6, 4294967168  ;;  %p1060_p11 = scmp.eq.s32.totalorder %s857_s16, 0 }
  0x54   : > { %783 = dma.done.wait (%p1060_p11), [#allocation6], 256   ;;  %p1061_p1 = pmov %p1060_p11 }
  0x55   : > { %v810_v0 = vmov 0.0|0.0   ;;  %vm811_vm0 = vmmov 0   ;;  %v812_v1 = vmov 0.0   ;;  %v202_v2 = vld [vmem:[#allocation5] sm:$0xff]  ;;  %v203_v3 = vld [vmem:[#allocation5 + $0x8] sm:$0xff]  ;;  %v201_v5 = vld [vmem:[%s174_s7] sm:$0xff] }
  0x56   : > { %785 = vsyncadd (%p1061_p1), [#allocation6], 4294967040  ;;  %605 = vmatprep.subr.bf16.mxu0 %v810_v0  ;;  %592 = vmatprep.mubr.msk.f32.mxu0 %vm811_vm0, %v812_v1  ;;  %v606_v4 = vpack.c.bf16 %v203_v3, %v202_v2  ;;  %vm211_vm1 = vcmask 130048   ;;  %v572_v6 = vld [vmem:[%s1046_s2] ss:$0 sm:$0xff]  ;;  %s813_s4 = smov 123  }
  0x57   : > { %595 = vmatprep.subr.mxu1 %v812_v1  ;;  %597 = vmatprep.mubr.msk.f32.mxu1 %vm811_vm0, %v812_v1  ;;  %s814_s25 = smov 118   ;;  %vm289_vm2 = vcmask 39936   ;;  %vm367_vm3 = vcmask 64512   ;;  %s578_s26 = sshll.u32 %s857_s16, 7  ;;  %vm465_vm4 = vcmask 105472  }
  0x58   : > { %607 = vmatpush3.bf16.msra.mxu0 %v606_v4  ;;  %s200_s5 = scalar_lea.vmem [#allocation7], %s569_s22  ;;  %s1000_s11 = scalar_lea.hbm %s1047_s3, %s578_s26 }
  0x59   : > { %600 = vmatprep.subr.mxu0 %v812_v1  ;;  %s482_s8 = sshll.u32 %s200_s5, 4  ;;  %s469_s16 = scalar_lea.sflag [#allocation4], %s972_s30  ;;  %s1002_s8 = int_to_ptr.vmem [resolvable:$true] %s482_s8 }
  0x5a   : > { %s734_s27 = scalar_lea.vmem %s1002_s8, 128  ;;  %s815_s28 = smov [#allocation7]  }
  0x5b   : > { %593 = vmatmul.mubr.msk.f32.vlgmr.msra.gmra.mrb[0].mxu0 %vm211_vm1, %v201_v5  ;;  %p735_p4 = scmp.ne.s32.totalorder %s1002_s8, %s734_s27  ;;  %s738_s29 = sshll.u32 %s815_s28, 4  ;;  %s739_s29 = int_to_ptr.vmem [resolvable:$false] %s738_s29 }
  0x5c   : > { %602 = vmatprep.mubr.msk.f32.mxu0 %vm811_vm0, %v812_v1  ;;  %s740_s23 = scalar_lea.vmem %s739_s29, 256  ;;  %p741_p10 = scmp.lt.s32.totalorder %s1002_s8, %s739_s29 }
  0x5d   : > { %p736_p6 = pnand %p735_p4, %p927_p12  ;;  %p742_p13 = scmp.lt.s32.totalorder %s740_s23, %s734_s27 }
  0x5f   : > { %p737_p8 = pneg %p736_p6  ;;  %p743_p3 = por %p742_p13, %p741_p10 }
  0x61   : > { %p744_p7 = pnand %p743_p3, %p737_p8 }
 0x12e   : > { %v281_v7 = vpop.f32.mrb[0].mxu0 }
 0x12f   : > { %v282_v8 = vadd.f32 %v572_v6, %v281_v7  ;;  %v594_v9 = vpop.f32.mrb[1].mxu0 }
 0x131   : > { %287 = vrot.lane.b32.xlu0 %v282_v8, %s813_s4  ;;  %v285_v10 = vmax.f32 %v282_v8, 0.0 }
 0x133   : > { %461 = vrot.lane.b32.xlu1 %v285_v10, %s814_s25 }
 0x135   : > { %364 = vrot.lane.b32.xlu0 %v282_v8, %s814_s25 }
 0x1a3   : > { %v288_v11 = vpop.permute.xlu0 %287 }
 0x1a4   : > { %596 = vmatpush3.xpose.msk.msra.mxu1 %vm289_vm2, %v288_v11 }
 0x1a5   : > { %v462_v36 = vpop.permute.xlu1 %461 }
 0x1a7   : > { %598 = vmatmul.mubr.msk.f32.vlgmr.msra.gmra.mrb[0].mxu1 %vm289_vm2, %v282_v8  ;;  %v365_v12 = vpop.permute.xlu0 %364 }
 0x1a8   : > { %601 = vmatpush3.msra.mxu0 %v365_v12 }
 0x27a   : > { %v360_v13 = vpop.f32.mrb[0].mxu1 }
 0x27b   : > { %v599_v14 = vpop.f32.mrb[1].mxu1  ;;  %603 = vmatmul.mubr.msk.f32.vlgmr.msra.gmra.mrb[2].mxu0 %vm367_vm3, %v360_v13 }
 0x34e   : > { %v437_v15 = vpop.f32.mrb[2].mxu0 }
 0x34f   : > { %v441_v16 = vsel %vm289_vm2, %v437_v15, -inf  ;;  %v604_v17 = vpop.f32.mrb[3].mxu0 }
 0x350   : > { %v442_v18 = vrot.slane %v441_v16, 4 }
 0x352   : > { %v443_v19 = vmax.f32 %v441_v16, %v442_v18 }
 0x354   : > { %v444_v20 = vrot.slane %v443_v19, 2 }
 0x356   : > { %v445_v21 = vmax.f32 %v443_v19, %v444_v20 }
 0x358   : > { %v446_v22 = vrot.slane %v445_v21, 1 }
 0x35a   : > { %v447_v23 = vmax.f32 %v445_v21, %v446_v22 }
 0x35c   : > { %v448_v24 = vsub.f32 %v437_v15, %v447_v23 }
 0x35e   : > { %v449_v25 = vmul.f32 1.442695, %v448_v24 }
 0x360   : > { %672 = vpow2.f32 %v449_v25 }
 0x36a   : > { %v673_v26 = vpop.eup %672 }
 0x36b   : > { %v451_v27 = vsel %vm289_vm2, %v673_v26, 0.0 }
 0x36c   : > { %v452_v28 = vrot.slane %v451_v27, 4 }
 0x36e   : > { %v453_v29 = vadd.f32 %v452_v28, %v451_v27 }
 0x370   : > { %v454_v30 = vrot.slane %v453_v29, 2 }
 0x372   : > { %v455_v31 = vadd.f32 %v454_v30, %v453_v29 }
 0x374   : > { %v456_v32 = vrot.slane %v455_v31, 1 }
 0x376   : > { %v457_v33 = vadd.f32 %v456_v32, %v455_v31 }
 0x378   : > { %674 = vrcp.f32 %v457_v33 }
 0x382   : > { %v675_v34 = vpop.eup %674 }
 0x383   : > { %v459_v35 = vmul.f32 %v675_v34, %v673_v26 }
 0x385   : > { %v464_v37 = vsel %vm289_vm2, %v459_v35, %v462_v36 }
 0x386   : > { %v466_v38 = vsel %vm465_vm4, %v464_v37, 0.0 }
 0x387   : > { %467 = vst [vmem:[%s200_s5] sm:$0xff] %v466_v38 }
 0x388   : > { %747 = shalt.err (!%p744_p7)
}
 0x389   : > { %s748_s30 = scalar_lea.hbm %s1000_s11, 128  ;;  %s752_s7 = scalar_lea.hbm %s1047_s3, 256 }
 0x38a   : > { %p749_p9 = scmp.ne.s32.totalorder %s1000_s11, %s748_s30  ;;  %p753_p0 = scmp.lt.u32.totalorder %s1000_s11, %s1047_s3 }
 0x38b   : > { %p754_p11 = scmp.lt.u32.totalorder %s752_s7, %s748_s30  ;;  %p756_p4 = scmp.lt.u32.totalorder %s748_s30, %s1000_s11 }
 0x38c   : > { %p750_p2 = pnand %p749_p9, %p927_p12 }
 0x38d   : > { %p755_p1 = por %p754_p11, %p753_p0 }
 0x38e   : > { %p751_p5 = pneg %p750_p2 }
 0x38f   : > { %p757_p6 = por %p756_p4, %p755_p1 }
 0x391   : > { %p758_p8 = pnand %p757_p6, %p751_p5 }
 0x393   : > { %761 = shalt.err (!%p758_p8)
}
 0x394   : > { %614 = dma.vmem_to_hbm [thread:$0]  (%p927_p12), %s1002_s8, 128, %s1000_s11, %s469_s16  }
 0x395 PF: > { %s494_s4 = sand.u32 1, %s792_s12   ;;  %p1062_p10 = scmp.ne.s32.totalorder %s1052_s19, 0 }
 0x396   : > { %p1063_p13 = scmp.ge.s32.totalorder %s804_s15, 2  ;;  %s495_s25 = scalar_lea.sflag [#allocation4], %s494_s4 }
 0x398   : > { %p625_p3 = pnand %p1063_p13, %p1062_p10 }
 0x39a   : > { %787 = dma.done.wait (!%p625_p3), %s495_s25, 128  }
 0x39b   : > { %789 = vsyncadd (!%p625_p3), %s495_s25, 4294967168  ;;  %p17_p7 = scmp.ge.s32.totalorder %s892_s24, 4   ;;  %s1064_s12 = smov %s796_s13 }
 0x39c   : > { %s1065_s13 = smov %s800_s14  ;;  %s1066_s14 = smov %s923_s17 }
 0x39d   : > { %s1067_s15 = smov %s892_s24  ;;  %19 = sbr.rel (!%p17_p7) target bundleno = 6 (0x6), region = 81 }
 0x3a4   :  { %500 = vsyncpa [#allocation3], 1 }
 0x3a5   :  { %502 = vsyncpa [#allocation3 + $0x1], 1 }
 0x3a6   :  { %503 = vsyncpa [#allocation6], 1 }
 0x3a7   :  { %504 = vsyncpa [#allocation4], 1 }
 0x3a8   :  { %506 = vsyncpa [#allocation4 + $0x1], 1 }

</bundles_post_ra>
